<compile_context>
chip_gen: v6e
topology: v6e:2x2x1
jax: 0.10.0
libtpu: 0.0.40
codegen_flags: <defaults>
</compile_context>

<pallas_src>
import functools

import jax
import jax.numpy as jnp
from jax import lax
from jax.experimental import pallas as pl
from jax.experimental.pallas import tpu as pltpu


def _round_up(x, m):
    return (x + m - 1) // m * m


def focal_loss_kernel(x_ref, tgt_ref, wt_ref, out_ref, *, gamma, n_rows):
    """x_ref: (T, C) logits, tgt_ref: (T, 1) int32, wt_ref: (T, 1) f32 row weights.

    out_ref: (1, 8, 128) f32 -- lanes [0, 64) hold this block's weighted-focal
    partial sum, lanes [64, 128) hold this block's weight partial sum.
    """
    x = x_ref[...].astype(jnp.float32)            # (T, C)
    tgt = tgt_ref[...]                            # (T, 1) int32
    wt = wt_ref[...].astype(jnp.float32)          # (T, 1)
    t, c = x.shape

    # ---- full-tile work: row max, exp, softmax denominator, target gather ----
    m = jnp.max(x, axis=-1, keepdims=True)                             # (T, 1)
    e = jnp.exp(x - m)                                                 # (T, C)  EUP
    s = jnp.sum(e, axis=-1, keepdims=True)                             # (T, 1)

    col = lax.broadcasted_iota(jnp.int32, (t, c), 1)
    tmask = col == tgt                                                 # (T, C)
    x_t = jnp.sum(jnp.where(tmask, x, 0.0), axis=-1, keepdims=True)    # x[i, t_i]

    # ---- per-row (T, 1) focal math ----
    log_prob_t = (x_t - m) - jnp.log(s)            # log_softmax(x)[i, t_i]
    prob_t = jnp.exp(log_prob_t)

    g = float(gamma)
    if g.is_integer() and 0.0 <= g <= 8.0:
        gi = int(g)
        if gi == 0:
            fm = jnp.ones_like(prob_t)
        else:
            omp = 1.0 - prob_t
            fm = omp
            for _ in range(gi - 1):                # gamma=2 -> fm = omp * omp
                fm = fm * omp
    else:
        # TODO(synk): torch would return NaN if rounding makes prob_t > 1; we clamp.
        omp = jnp.maximum(1.0 - prob_t, jnp.float32(jnp.finfo(jnp.float32).tiny))
        fm = omp ** jnp.float32(g)
    focal_t = fm * log_prob_t                                          # (T, 1)

    # ---- mask rows past the true batch size (true select: edge garbage dies) ----
    row = lax.broadcasted_iota(jnp.int32, (t, 1), 0) + pl.program_id(0) * t
    valid = row < n_rows
    num_partial = jnp.sum(jnp.where(valid, wt * focal_t, 0.0))
    den_partial = jnp.sum(jnp.where(valid, wt, 0.0))

    # ---- single lane-dense (1, 8, 128) store: num | den in disjoint lane halves ----
    lane = lax.broadcasted_iota(jnp.int32, out_ref.shape, 2)
    out_ref[...] = jnp.where(lane < 64,
                             jnp.broadcast_to(num_partial, out_ref.shape),
                             jnp.broadcast_to(den_partial, out_ref.shape))


def focal_loss(logits, targets, weight=None, gamma=2.0, reduction="mean", tile_n=None):
    """logits: (N, C) float (f32 or bf16), targets: (N,) int.  Matches torch FocalLoss."""
    # TODO(synk): only reduction='mean' (the module default) is implemented.
    assert reduction == "mean", "only 'mean' reduction implemented"
    n, c = logits.shape
    targets = targets.astype(jnp.int32)

    # Per-row class weights gathered in plain JAX (tiny N-element gather).
    if weight is None:
        wt = jnp.ones((n,), dtype=jnp.float32)
    else:
        wt = jnp.asarray(weight, jnp.float32)[targets]

    tgt2d = targets.reshape(n, 1)
    wt2d = wt.reshape(n, 1)

    # Tile size: byte-budget driven (~6 MiB of f32-equivalent logits per tile; no
    # row cap), rows a multiple of 16 for bf16 sublane packing, clamped to batch.
    if tile_n is None:
        target_bytes = 6 * 1024 * 1024
        tile_n = max(16, (target_bytes // (c * 4)) // 16 * 16)
    tile_n = max(8, min(int(tile_n), _round_up(n, 8)))
    tile_n = (tile_n // 8) * 8
    num_blocks = (n + tile_n - 1) // tile_n

    grid_spec = pltpu.PrefetchScalarGridSpec(
        num_scalar_prefetch=0,
        grid=(num_blocks,),
        in_specs=[
            pl.BlockSpec((tile_n, c), lambda i: (i, 0)),   # logits (full class dim, no pad)
            pl.BlockSpec((tile_n, 1), lambda i: (i, 0)),   # targets
            pl.BlockSpec((tile_n, 1), lambda i: (i, 0)),   # per-row weights
        ],
        out_specs=pl.BlockSpec((1, 8, 128), lambda i: (i, 0, 0)),
    )

    part = pl.pallas_call(
        functools.partial(focal_loss_kernel, gamma=float(gamma), n_rows=n),
        out_shape=jax.ShapeDtypeStruct((num_blocks, 8, 128), jnp.float32),
        grid_spec=grid_spec,
        compiler_params=pltpu.CompilerParams(
            dimension_semantics=("parallel",),
            vmem_limit_bytes=48 * 1024 * 1024,
        ),
    )(logits, tgt2d, wt2d)

    # Final 'mean' reduction in the wrapper: -sum(w_i * focal_i) / sum(w_i).
    num = jnp.sum(part[:, 0, 0])
    den = jnp.sum(part[:, 0, 64])
    return -num / den


def focal_loss_ref(logits, targets, weight=None, gamma=2.0):
    """Plain-JAX reference mirroring the torch code."""
    n, c = logits.shape
    if weight is None:
        weight = jnp.ones((c,), dtype=jnp.float32)
    log_prob = jax.nn.log_softmax(logits.astype(jnp.float32), axis=-1)
    prob = jnp.exp(log_prob)
    focal = ((1.0 - prob) ** gamma) * log_prob
    picked = focal[jnp.arange(n), targets]
    wt = weight[targets]
    return -jnp.sum(wt * picked) / jnp.sum(wt)


if __name__ == "__main__":
    key = jax.random.PRNGKey(0)
    k1, k2, k3, k4, k5, k6 = jax.random.split(key, 6)

    # Case 1: small single-tile problem (batch=16, classes=32), weighted path.
    N1, C1 = 16, 32
    logits1 = jax.random.normal(k1, (N1, C1), dtype=jnp.float32)
    targets1 = jax.random.randint(k2, (N1,), 0, C1, dtype=jnp.int32)
    weight1 = 0.5 + 0.05 * jnp.arange(C1, dtype=jnp.float32)
    loss1 = jax.block_until_ready(
        focal_loss(logits1, targets1, weight=weight1, gamma=2.0, reduction="mean"))
    ref1 = focal_loss_ref(logits1, targets1, weight=weight1, gamma=2.0)
    assert jnp.allclose(loss1, ref1, rtol=1e-5, atol=1e-5), (loss1, ref1)

    # Case 2: multi-block grid with a partial last tile (row masking + parallel axis),
    # unweighted, non-128-aligned class count (exercises the no-pad full-C block).
    N2, C2 = 200, 40
    logits2 = jax.random.normal(k3, (N2, C2), dtype=jnp.float32)
    targets2 = jax.random.randint(k4, (N2,), 0, C2, dtype=jnp.int32)
    loss2 = jax.block_until_ready(
        focal_loss(logits2, targets2, weight=None, gamma=2.0, reduction="mean", tile_n=64))
    ref2 = focal_loss_ref(logits2, targets2, weight=None, gamma=2.0)
    assert jnp.allclose(loss2, ref2, rtol=1e-5, atol=1e-5), (loss2, ref2)

    # Case 3: bf16 logits pass-through (halved HBM read), weighted, gamma=2.
    N3, C3 = 48, 24
    logits3 = jax.random.normal(k5, (N3, C3), dtype=jnp.float32).astype(jnp.bfloat16)
    targets3 = jax.random.randint(k6, (N3,), 0, C3, dtype=jnp.int32)
    weight3 = 1.0 + 0.1 * jnp.arange(C3, dtype=jnp.float32)
    loss3 = jax.block_until_ready(
        focal_loss(logits3, targets3, weight=weight3, gamma=2.0, reduction="mean"))
    ref3 = focal_loss_ref(logits3.astype(jnp.float32), targets3, weight=weight3, gamma=2.0)
    assert jnp.allclose(loss3, ref3, rtol=1e-4, atol=1e-4), (loss3, ref3)

    print("KERNEL_OK")
</pallas_src>

<mosaic_0001>
module attributes {stable_mosaic.version = 11 : i64} {
  func.func @focal_loss_kernel(%arg0: i32, %arg1: memref<16x32xf32, #tpu.memory_space<vmem>>, %arg2: memref<16x1xi32, #tpu.memory_space<vmem>>, %arg3: memref<16x1xf32, #tpu.memory_space<vmem>>, %arg4: memref<1x8x128xf32, #tpu.memory_space<vmem>>) attributes {dimension_semantics = [#tpu.dimension_semantics<parallel>], iteration_bounds = array<i64: 1>, scalar_prefetch = 0 : i64, scratch_operands = 0 : i64, tpu.core_type = #tpu.core_type<tc>, window_params = [{transform_indices = @transform_0, window_bounds = array<i64: 16, 32>}, {transform_indices = @transform_1, window_bounds = array<i64: 16, 1>}, {transform_indices = @transform_2, window_bounds = array<i64: 16, 1>}, {transform_indices = @transform_3, window_bounds = array<i64: 1, 8, 128>}]} {
    %c0 = arith.constant 0 : index
    %c0_0 = arith.constant 0 : index
    %0 = vector.load %arg1[%c0, %c0_0] : memref<16x32xf32, #tpu.memory_space<vmem>>, vector<16x32xf32>
    %c0_1 = arith.constant 0 : index
    %c0_2 = arith.constant 0 : index
    %1 = vector.load %arg2[%c0_1, %c0_2] : memref<16x1xi32, #tpu.memory_space<vmem>>, vector<16x1xi32>
    %c0_3 = arith.constant 0 : index
    %c0_4 = arith.constant 0 : index
    %2 = vector.load %arg3[%c0_3, %c0_4] : memref<16x1xf32, #tpu.memory_space<vmem>>, vector<16x1xf32>
    %cst = arith.constant dense<0xFF800000> : vector<16xf32>
    %3 = vector.multi_reduction <maximumf>, %0, %cst [1] : vector<16x32xf32> to vector<16xf32>
    %4 = vector.shape_cast %3 : vector<16xf32> to vector<16x1xf32>
    %5 = vector.broadcast %4 : vector<16x1xf32> to vector<16x32xf32>
    %6 = arith.subf %0, %5 : vector<16x32xf32>
    %7 = math.exp %6 : vector<16x32xf32>
    %cst_5 = arith.constant dense<0.000000e+00> : vector<16xf32>
    %8 = vector.multi_reduction <add>, %7, %cst_5 [1] : vector<16x32xf32> to vector<16xf32>
    %9 = vector.shape_cast %8 : vector<16xf32> to vector<16x1xf32>
    %10 = tpu.iota {dimensions = array<i32: 1>} : vector<16x32xi32>
    %11 = vector.broadcast %1 : vector<16x1xi32> to vector<16x32xi32>
    %12 = arith.cmpi eq, %10, %11 : vector<16x32xi32>
    %cst_6 = arith.constant 0.000000e+00 : f32
    %13 = vector.broadcast %cst_6 : f32 to vector<16x32xf32>
    %14 = arith.select %12, %0, %13 : vector<16x32xi1>, vector<16x32xf32>
    %cst_7 = arith.constant dense<0.000000e+00> : vector<16xf32>
    %15 = vector.multi_reduction <add>, %14, %cst_7 [1] : vector<16x32xf32> to vector<16xf32>
    %16 = vector.shape_cast %15 : vector<16xf32> to vector<16x1xf32>
    %17 = arith.subf %16, %4 : vector<16x1xf32>
    %18 = math.log %9 : vector<16x1xf32>
    %19 = arith.subf %17, %18 : vector<16x1xf32>
    %20 = math.exp %19 : vector<16x1xf32>
    %cst_8 = arith.constant 1.000000e+00 : f32
    %21 = vector.broadcast %cst_8 : f32 to vector<16x1xf32>
    %22 = arith.subf %21, %20 : vector<16x1xf32>
    %23 = arith.mulf %22, %22 : vector<16x1xf32>
    %24 = arith.mulf %23, %19 : vector<16x1xf32>
    %25 = tpu.iota {dimensions = array<i32: 0>} : vector<16x1xi32>
    %c16_i32 = arith.constant 16 : i32
    %26 = arith.muli %arg0, %c16_i32 : i32
    %27 = vector.broadcast %26 : i32 to vector<16x1xi32>
    %28 = arith.addi %25, %27 : vector<16x1xi32>
    %c16_i32_9 = arith.constant 16 : i32
    %29 = vector.broadcast %c16_i32_9 : i32 to vector<16x1xi32>
    %30 = arith.cmpi slt, %28, %29 : vector<16x1xi32>
    %31 = arith.mulf %2, %24 : vector<16x1xf32>
    %cst_10 = arith.constant 0.000000e+00 : f32
    %32 = vector.broadcast %cst_10 : f32 to vector<16x1xf32>
    %33 = arith.select %30, %31, %32 : vector<16x1xi1>, vector<16x1xf32>
    %34 = vector.shape_cast %33 : vector<16x1xf32> to vector<1x16x1xf32>
    %cst_11 = arith.constant dense<0.000000e+00> : vector<1xf32>
    %35 = vector.multi_reduction <add>, %34, %cst_11 [1, 2] : vector<1x16x1xf32> to vector<1xf32>
    %36 = vector.shape_cast %35 : vector<1xf32> to vector<1x1x1xf32>
    %37 = vector.extract %36[0, 0, 0] : f32 from vector<1x1x1xf32>
    %cst_12 = arith.constant 0.000000e+00 : f32
    %38 = vector.broadcast %cst_12 : f32 to vector<16x1xf32>
    %39 = arith.select %30, %2, %38 : vector<16x1xi1>, vector<16x1xf32>
    %40 = vector.shape_cast %39 : vector<16x1xf32> to vector<1x16x1xf32>
    %cst_13 = arith.constant dense<0.000000e+00> : vector<1xf32>
    %41 = vector.multi_reduction <add>, %40, %cst_13 [1, 2] : vector<1x16x1xf32> to vector<1xf32>
    %42 = vector.shape_cast %41 : vector<1xf32> to vector<1x1x1xf32>
    %43 = vector.extract %42[0, 0, 0] : f32 from vector<1x1x1xf32>
    %44 = tpu.iota {dimensions = array<i32: 2>} : vector<1x8x128xi32>
    %c64_i32 = arith.constant 64 : i32
    %45 = vector.broadcast %c64_i32 : i32 to vector<1x8x128xi32>
    %46 = arith.cmpi slt, %44, %45 : vector<1x8x128xi32>
    %47 = vector.broadcast %37 : f32 to vector<1x8x128xf32>
    %48 = vector.broadcast %43 : f32 to vector<1x8x128xf32>
    %49 = arith.select %46, %47, %48 : vector<1x8x128xi1>, vector<1x8x128xf32>
    %c0_14 = arith.constant 0 : index
    %c0_15 = arith.constant 0 : index
    %c0_16 = arith.constant 0 : index
    %50 = vector.load %arg4[%c0_14, %c0_15, %c0_16] : memref<1x8x128xf32, #tpu.memory_space<vmem>>, vector<1x8x128xf32>
    tpu.vector_store %arg4[%c0_14, %c0_15, %c0_16], %49 {strides = array<i32>} : memref<1x8x128xf32, #tpu.memory_space<vmem>>, vector<1x8x128xf32>,
    return
  }
  func.func @transform_0(%arg0: i32) -> (i32, i32) {
    %c0_i32 = arith.constant 0 : i32
    %c0_i32_0 = arith.constant 0 : i32
    return %arg0, %c0_i32 : i32, i32
  }
  func.func @transform_1(%arg0: i32) -> (i32, i32) {
    %c0_i32 = arith.constant 0 : i32
    %c0_i32_0 = arith.constant 0 : i32
    return %arg0, %c0_i32 : i32, i32
  }
  func.func @transform_2(%arg0: i32) -> (i32, i32) {
    %c0_i32 = arith.constant 0 : i32
    %c0_i32_0 = arith.constant 0 : i32
    return %arg0, %c0_i32 : i32, i32
  }
  func.func @transform_3(%arg0: i32) -> (i32, i32, i32) {
    %c0_i32 = arith.constant 0 : i32
    %c0_i32_0 = arith.constant 0 : i32
    %c0_i32_1 = arith.constant 0 : i32
    return %arg0, %c0_i32, %c0_i32_0 : i32, i32, i32
  }
}

</mosaic_0001>

<bundles_post_ra>
// kernel: tpu_custom_call.1
= control target key start
LH: loop header
LB: loop body
LE: loop exit
PB: predicated region body
PF: predicated region fallthrough
CT: control target
= control target key end

     0   :  { %vm21_vm0 = vcmask 261120   ;;  %v177_v4 = vmov 0   ;;  %s231_s0 = inlined_call_operand.vmem [shape: f32[16,32], index: 0, kind: input, shape index: {}]   ;;  %s232_s1 = inlined_call_operand.vmem [shape: s32[16,1], index: 1, kind: input, shape index: {}]   ;;  %s233_s2 = inlined_call_operand.vmem [shape: f32[16,1], index: 2, kind: input, shape index: {}]   ;;  %s234_s3 = inlined_call_operand.hbm [shape: f32[1,8,128], index: 3, kind: output, shape index: {}]  }
   0x1   :  { %v15_v0 = vld [vmem:[%s231_s0] sm:$0xff]  ;;  %v16_v1 = vld [vmem:[%s231_s0 + $0x8] sm:$0xff]  ;;  %141 = vset.pattern.permute.xlu1 %v177_v4  ;;  %142 = vset.pattern.permute.xlu0 %v177_v4 }
   0x2   :  { %v17_v2 = vld [vmem:[%s232_s1] sm:$0xff]  ;;  %v22_v3 = vsel %vm21_vm0, %v15_v0, -inf }
   0x3   :  { %8 = vsyncpa [#allocation3], 0  ;;  %23 = vmax.xlane.f32.xlu0 %v22_v3  ;;  %43 = vperm.xlu1 %141, %v17_v2   ;;  %v25_v5 = vsel %vm21_vm0, %v16_v1, -inf  ;;  %v18_v6 = vld [vmem:[%s232_s1 + $0x8] sm:$0xff]  ;;  %v40_v13 = vlaneseq  ;;  %v19_v45 = vld [vmem:[%s233_s2] sm:$0xff]  ;;  %vm89_vm3 = vcmask 7168  }
   0x4   :  { %v20_v47 = vld [vmem:[%s233_s2 + $0x8] sm:$0xff]  ;;  %v104_v53 = vsel %vm89_vm3, %v19_v45, 0.0  ;;  %s178_s22 = smov [#allocation2]  }
   0x5   :  { %v213_v15 = vand.u32 127, %v40_v13  ;;  %v105_v54 = vsel %vm89_vm3, %v20_v47, 0.0  ;;  %s127_s23 = sshll.u32 %s178_s22, 4  ;;  %s128_s23 = int_to_ptr.vmem [resolvable:$true] %s127_s23 }
   0x6   :  { %v106_v56 = vadd.f32 %v105_v54, %v104_v53  ;;  %s155_s25 = scalar_lea.vmem %s128_s23, 128  ;;  %p160_p1 = scmp.lt.s32.totalorder %s128_s23, %s128_s23 }
   0x7   :  { %26 = vmax.xlane.f32.xlu0 %v25_v5  ;;  %46 = vperm.xlu1 %141, %v18_v6   ;;  %vm116_vm4 = vcmp.lt.s32.totalorder %v213_v15, 64  ;;  %p156_p0 = scmp.ne.s32.totalorder %s128_s23, %s155_s25  ;;  %p161_p2 = scmp.lt.s32.totalorder %s155_s25, %s155_s25 }
   0x9   :  { %p162_p3 = por %p161_p2, %p160_p1 }
   0xb   :  { %p163_p4 = pnand %p162_p3, %p156_p0 }
  0x7e   :  { %v44_v14 = vpop.permute.xlu1 %43 }
  0x7f   :  { %vm48_vm1 = vcmp.eq.s32.totalorder %v213_v15, %v44_v14 }
  0x80   :  { %v50_v18 = vsel %vm48_vm1, %v15_v0, 0.0 }
  0x81   :  { %v52_v20 = vsel %vm21_vm0, %v50_v18, 0.0 }
  0x82   :  { %v47_v16 = vpop.permute.xlu1 %46 }
  0x83   :  { %vm49_vm2 = vcmp.eq.s32.totalorder %v213_v15, %v47_v16 }
  0x84   :  { %v51_v22 = vsel %vm49_vm2, %v16_v1, 0.0 }
  0x85   :  { %v55_v24 = vsel %vm21_vm0, %v51_v22, 0.0 }
  0x8c   :  { %v24_v7 = vpop.xlane.xlu0 %23 }
  0x8d   :  { %v28_v8 = vsub.f32 %v15_v0, %v24_v7 }
  0x8f   :  { %v30_v9 = vmul.f32 1.442695, %v28_v8 }
  0x90   :  { %v27_v10 = vpop.xlane.xlu0 %26 }
  0x91   :  { %143 = vpow2.f32 %v30_v9  ;;  %v29_v11 = vsub.f32 %v16_v1, %v27_v10 }
  0x93   :  { %v32_v12 = vmul.f32 1.442695, %v29_v11 }
  0x95   :  { %145 = vpow2.f32 %v32_v12 }
  0x9e   :  { %v144_v17 = vpop.eup %143 }
  0x9f   :  { %v34_v19 = vsel %vm21_vm0, %v144_v17, 0.0 }
  0xa0   :  { %35 = vadd.xlane.f32.xlu0 %v34_v19 }
  0xa2   :  { %v146_v21 = vpop.eup %145 }
  0xa3   :  { %v37_v23 = vsel %vm21_vm0, %v146_v21, 0.0 }
  0xa4   :  { %53 = vadd.xlane.f32.xlu0 %v52_v20  ;;  %38 = vadd.xlane.f32.xlu1 %v37_v23 }
  0xa8   :  { %56 = vadd.xlane.f32.xlu0 %v55_v24 }
 0x129   :  { %v36_v25 = vpop.xlane.xlu0 %35 }
 0x12a   :  { %147 = vlog2.f32 %v36_v25 }
 0x12d   :  { %v39_v26 = vpop.xlane.xlu1 %38  ;;  %v54_v27 = vpop.xlane.xlu0 %53 }
 0x12e   :  { %149 = vlog2.f32 %v39_v26  ;;  %v58_v30 = vsub.f32 %v54_v27, %v24_v7 }
 0x131   :  { %v57_v31 = vpop.xlane.xlu0 %56 }
 0x132   :  { %v59_v36 = vsub.f32 %v57_v31, %v27_v10 }
 0x137   :  { %v148_v28 = vpop.eup %147 }
 0x138   :  { %v61_v29 = vmul.f32 0.6931472, %v148_v28 }
 0x13a   :  { %v64_v32 = vsub.f32 %v58_v30, %v61_v29 }
 0x13b   :  { %v150_v33 = vpop.eup %149 }
 0x13c   :  { %v63_v34 = vmul.f32 0.6931472, %v150_v33  ;;  %v66_v35 = vmul.f32 1.442695, %v64_v32 }
 0x13e   :  { %151 = vpow2.f32 %v66_v35  ;;  %v65_v37 = vsub.f32 %v59_v36, %v63_v34 }
 0x140   :  { %v68_v38 = vmul.f32 1.442695, %v65_v37 }
 0x142   :  { %153 = vpow2.f32 %v68_v38 }
 0x14b   :  { %v152_v39 = vpop.eup %151 }
 0x14c   :  { %v70_v40 = vsub.f32 1.0, %v152_v39 }
 0x14e   :  { %v72_v41 = vmul.f32 %v70_v40, %v70_v40 }
 0x14f   :  { %v154_v42 = vpop.eup %153 }
 0x150   :  { %v74_v43 = vmul.f32 %v72_v41, %v64_v32  ;;  %v71_v44 = vsub.f32 1.0, %v154_v42 }
 0x152   :  { %v73_v46 = vmul.f32 %v71_v44, %v71_v44  ;;  %v85_v49 = vmul.f32 %v74_v43, %v19_v45 }
 0x154   :  { %v75_v48 = vmul.f32 %v73_v46, %v65_v37  ;;  %v90_v51 = vsel %vm89_vm3, %v85_v49, 0.0 }
 0x156   :  { %v86_v50 = vmul.f32 %v75_v48, %v20_v47 }
 0x158   :  { %v91_v52 = vsel %vm89_vm3, %v86_v50, 0.0 }
 0x159   :  { %v92_v55 = vadd.f32 %v91_v52, %v90_v51 }
 0x15b   :  { %93 = vadd.xlane.f32.xlu0 %v92_v55 }
 0x15f   :  { %107 = vadd.xlane.f32.xlu0 %v106_v56 }
 0x1e4   :  { %v94_v57 = vpop.xlane.xlu0 %93 }
 0x1e5   :  { %v95_v58 = vrot.slane %v94_v57, 4 }
 0x1e7   :  { %v96_v59 = vadd.f32 %v95_v58, %v94_v57 }
 0x1e8   :  { %v108_v60 = vpop.xlane.xlu0 %107 }
 0x1e9   :  { %v97_v61 = vrot.slane %v96_v59, 2  ;;  %v109_v62 = vrot.slane %v108_v60, 4 }
 0x1eb   :  { %v110_v63 = vadd.f32 %v109_v62, %v108_v60  ;;  %v98_v0 = vadd.f32 %v97_v61, %v96_v59 }
 0x1ed   :  { %v111_v1 = vrot.slane %v110_v63, 2  ;;  %v99_v2 = vrot.slane %v98_v0, 1 }
 0x1ef   :  { %v112_v3 = vadd.f32 %v111_v1, %v110_v63  ;;  %v100_v4 = vadd.f32 %v99_v2, %v98_v0 }
 0x1f1   :  { %135 = vpush %v100_v4  ;;  %v113_v5 = vrot.slane %v112_v3, 1 }
 0x1f3   :  { %v114_v6 = vadd.f32 %v113_v5, %v112_v3 }
 0x1f5   :  { %137 = vpush %v114_v6 }
 0x222   :  { %s136_s2 = spop %135 }
 0x223   :  { %v117_v7 = vstv %s136_s2 }
 0x226   :  { %s138_s24 = spop %137 }
 0x227   :  { %v118_v8 = vstv %s138_s24 }
 0x228   :  { %v119_v9 = vsel %vm116_vm4, %v117_v7, %v118_v8 }
 0x229   :  { %120 = vst [vmem:[#allocation2] sm:$0xff] %v119_v9 }
 0x22a   :  { %166 = shalt.err (!%p163_p4)
}
 0x22b   :  { %130 = dma.vmem_to_hbm [thread:$0]  %s128_s23, 128, %s234_s3, [#allocation3]  }
 0x22c   :  { %175 = dma.done.wait [#allocation3], 128  }
 0x22d   :  { %176 = vsyncadd [#allocation3], 4294967168 }
 0x22e   :  { %134 = vsyncpa [#allocation3], 1 }

</bundles_post_ra>
